<compile_context>
chip_gen: v5e
topology: v5e:2x2
jax: 0.10.0
libtpu: 0.0.40
codegen_flags: <defaults>
</compile_context>

<pallas_src>
import jax
import jax.numpy as jnp
from jax import lax
from jax.experimental import pallas as pl
from jax.experimental.pallas import tpu as pltpu
import numpy as np

LN_EPS = 1e-5            # nn.LayerNorm default eps
SQRT_HALF = 0.7071067811865476


def _erf_approx(x):
    # Abramowitz & Stegun 7.1.26 rational approximation, |err| <= 1.5e-7.
    # Reproduces PyTorch's exact (erf-based) nn.GELU() within f32 tolerance using only
    # Mosaic-supported elementwise ops (exp, mul, add, where).
    a1, a2, a3, a4, a5 = 0.254829592, -0.284496736, 1.421413741, -1.453152027, 1.061405429
    p = 0.3275911
    sgn = jnp.where(x >= 0.0, 1.0, -1.0)
    ax = jnp.abs(x)
    t = 1.0 / (1.0 + p * ax)
    poly = ((((a5 * t + a4) * t + a3) * t + a2) * t + a1) * t
    return sgn * (1.0 - poly * jnp.exp(-ax * ax))


def _gelu_exact(x):
    return 0.5 * x * (1.0 + _erf_approx(x * SQRT_HALF))


def _hit_kernel(x_ref, lnw_ref, lnb_ref,
                wi_ref, bi_ref,
                mu_ref, mv_ref,
                wou_ref, wov_ref, bcomb_ref, o_ref):
    # x_ref: (C, S) one sample, channels on sublanes, flattened H*W on lanes.
    x = x_ref[...]

    # LayerNorm over (C, H, W) per sample (biased variance, like PyTorch).
    mean = jnp.mean(x, keepdims=True)                        # (1, 1)
    var = jnp.mean((x - mean) ** 2, keepdims=True)           # (1, 1)
    y = (x - mean) * lax.rsqrt(var + LN_EPS) * lnw_ref[...] + lnb_ref[...]

    # Linear_in (C -> 2C) as a single MXU matmul, then one exact-GELU pass.
    z = _gelu_exact(jnp.dot(wi_ref[...], y, preferred_element_type=jnp.float32)
                    + bi_ref[...])                           # (2C, S)
    c = z.shape[0] // 2
    u = z[:c]                                                # (C, S) grid-mixing branch
    v = z[c:]                                                # (C, S) block-mixing branch

    # Spatial mixing: block/unblock + transpose + linear_transpose folded into dense
    # (S, S) mixing matrices -> lane-dense MXU matmuls (biases folded into bcomb).
    u2 = jnp.dot(u, mu_ref[...], preferred_element_type=jnp.float32)     # (C, S)
    v2 = jnp.dot(v, mv_ref[...], preferred_element_type=jnp.float32)     # (C, S)

    # Linear_out on concat([u, v]) expressed as two (C, C) matmuls (no in-kernel concat);
    # bcomb already contains W_out @ mixing-bias + b_out.
    o_ref[...] = (jnp.dot(wou_ref[...], u2, preferred_element_type=jnp.float32)
                  + jnp.dot(wov_ref[...], v2, preferred_element_type=jnp.float32)
                  + bcomb_ref[...])
    # TODO(synk): nn.Dropout is identity at inference / drop=0.0; training-mode RNG not applied.


def _build_mixing(wt, bt, h, w, grid_size):
    """Fold block_images + transpose + Linear(linear_transpose) + unblock into (S,S) matrices.

    u-branch: mixes across grid cells for a fixed within-patch position.
    v-branch: mixes within a block for a fixed block.
    Returns Mu, bu, Mv, bv such that  branch(x)[c, s'] = sum_s x[c, s] * M[s, s'] + b[s'].
    """
    g_h, g_w = grid_size
    S = h * w
    s = jnp.arange(S)
    ii, jj = s // w, s % w

    # u branch: patch_size = (h // gh, w // gw)
    fh, fw = h // g_h, w // g_w
    q_u = (ii // fh) * g_w + (jj // fw)          # grid-cell index     (size gh*gw)
    p_u = (ii % fh) * fw + (jj % fw)             # within-patch index  (size fh*fw)
    mu = jnp.where(p_u[:, None] == p_u[None, :], wt[q_u[None, :], q_u[:, None]], 0.0)
    bu = bt[q_u]

    # v branch: patch_size = grid_size, grid = (h // gh, w // gw)
    gw2 = w // g_w
    q_v = (ii // g_h) * gw2 + (jj // g_w)        # block index
    p_v = (ii % g_h) * g_w + (jj % g_w)          # within-patch index  (size gh*gw)
    mv = jnp.where(q_v[:, None] == q_v[None, :], wt[p_v[None, :], p_v[:, None]], 0.0)
    bv = bt[p_v]

    return mu, bu.reshape(1, S), mv, bv.reshape(1, S)


def hit_forward(x, ln_w, ln_b, w_in, b_in, wt, bt, w_out, b_out, grid_size):
    """HiT forward. x: (N, C, H, W) -> (N, C, H, W)."""
    N, C, H, W = x.shape
    S = H * W
    f32 = jnp.float32

    x_cs = x.reshape(N, C, S).astype(f32)          # free reshape, no transpose
    lnw = ln_w.reshape(C, S).astype(f32)
    lnb = ln_b.reshape(C, S).astype(f32)
    w_in_f = w_in.astype(f32)                      # (2C, C)
    b_in_f = b_in.reshape(2 * C, 1).astype(f32)

    mu, bu, mv, bv = _build_mixing(wt.astype(f32), bt.astype(f32), H, W, grid_size)

    w_out_u = w_out[:, :C].astype(f32)             # (C, C)
    w_out_v = w_out[:, C:].astype(f32)             # (C, C)
    # Fold mixing biases through W_out together with b_out into one (C, S) bias:
    #   W_out_u @ broadcast(bu) = rowsum(W_out_u)[:, None] * bu[None, :]   (same for v).
    b_comb = (w_out_u.sum(axis=1, keepdims=True) * bu
              + w_out_v.sum(axis=1, keepdims=True) * bv
              + b_out.reshape(C, 1).astype(f32))   # (C, S)

    rep = lambda n: (0, 0)   # weights: same block every grid step (stay VMEM-resident)

    out = pl.pallas_call(
        _hit_kernel,
        out_shape=jax.ShapeDtypeStruct((N, C, S), f32),
        grid_spec=pltpu.PrefetchScalarGridSpec(
            num_scalar_prefetch=0,
            grid=(N,),
            in_specs=[
                pl.BlockSpec((None, C, S), lambda n: (n, 0, 0)),   # x (per sample)
                pl.BlockSpec((C, S), rep),                         # LN weight
                pl.BlockSpec((C, S), rep),                         # LN bias
                pl.BlockSpec((2 * C, C), rep),                     # W_in
                pl.BlockSpec((2 * C, 1), rep),                     # b_in
                pl.BlockSpec((S, S), rep),                         # Mu
                pl.BlockSpec((S, S), rep),                         # Mv
                pl.BlockSpec((C, C), rep),                         # W_out (u half)
                pl.BlockSpec((C, C), rep),                         # W_out (v half)
                pl.BlockSpec((C, S), rep),                         # fused bias
            ],
            out_specs=pl.BlockSpec((None, C, S), lambda n: (n, 0, 0)),
        ),
        compiler_params=pltpu.CompilerParams(
            dimension_semantics=("parallel",),                     # batch sharded across TCs
        ),
    )(x_cs, lnw, lnb, w_in_f, b_in_f, mu, mv, w_out_u, w_out_v, b_comb)

    return out.reshape(N, C, H, W)


def _reference(x, ln_w, ln_b, w_in, b_in, wt, bt, w_out, b_out, grid_size):
    """Pure-JAX reference reproducing the PyTorch HiT forward (eval-mode dropout)."""
    N, C, H, W = x.shape
    mean = x.mean(axis=(1, 2, 3), keepdims=True)
    var = ((x - mean) ** 2).mean(axis=(1, 2, 3), keepdims=True)
    y = (x - mean) / jnp.sqrt(var + LN_EPS) * ln_w[None] + ln_b[None]
    y = jnp.transpose(y, (0, 2, 3, 1))                               # NHWC
    z = y @ w_in.T + b_in
    z = jax.nn.gelu(z, approximate=False)                            # exact erf GELU
    u, v = z[..., :C], z[..., C:]

    gh, gw = grid_size
    fh, fw = H // gh, W // gw
    # u branch: mix across grid cells
    ub = u.reshape(N, gh, fh, gw, fw, C).transpose(0, 1, 3, 2, 4, 5).reshape(N, gh * gw, fh * fw, C)
    ut = jnp.swapaxes(ub, -1, -3)
    ut = ut @ wt.T + bt
    ub = jnp.swapaxes(ut, -1, -3)
    u2 = ub.reshape(N, gh, gw, fh, fw, C).transpose(0, 1, 3, 2, 4, 5).reshape(N, H, W, C)
    # v branch: mix within blocks
    fh2, fw2 = grid_size
    gh2, gw2 = H // fh2, W // fw2
    vb = v.reshape(N, gh2, fh2, gw2, fw2, C).transpose(0, 1, 3, 2, 4, 5).reshape(N, gh2 * gw2, fh2 * fw2, C)
    vt = jnp.swapaxes(vb, -1, -2)
    vt = vt @ wt.T + bt
    vb = jnp.swapaxes(vt, -1, -2)
    v2 = vb.reshape(N, gh2, gw2, fh2, fw2, C).transpose(0, 1, 3, 2, 4, 5).reshape(N, H, W, C)

    out = jnp.concatenate([u2, v2], axis=-1) @ w_out.T + b_out
    return jnp.transpose(out, (0, 3, 1, 2))                          # back to NCHW


if __name__ == "__main__":
    key = jax.random.PRNGKey(0)
    keys = jax.random.split(key, 8)

    # HiT(num_channels=8, drop=0.0, grid_size=(4,4), feat_size=16) on x: (2, 8, 16, 16)
    N, C, H = 2, 8, 16
    W = H
    grid_size = (4, 4)
    G = grid_size[1] * grid_size[1]        # linear_transpose feature size

    x = jax.random.normal(keys[0], (N, C, H, W), dtype=jnp.float32)
    ln_w = 1.0 + 0.1 * jax.random.normal(keys[1], (C, H, W), dtype=jnp.float32)
    ln_b = 0.1 * jax.random.normal(keys[2], (C, H, W), dtype=jnp.float32)
    w_in = jax.random.normal(keys[3], (2 * C, C), dtype=jnp.float32) / np.sqrt(C)
    b_in = 0.1 * jax.random.normal(keys[4], (2 * C,), dtype=jnp.float32)
    wt = jax.random.normal(keys[5], (G, G), dtype=jnp.float32) / np.sqrt(G)
    bt = 0.1 * jax.random.normal(keys[6], (G,), dtype=jnp.float32)
    w_out = jax.random.normal(keys[7], (C, 2 * C), dtype=jnp.float32) / np.sqrt(2 * C)
    b_out = 0.05 * jnp.ones((C,), dtype=jnp.float32)

    out = jax.block_until_ready(
        hit_forward(x, ln_w, ln_b, w_in, b_in, wt, bt, w_out, b_out, grid_size))
    assert out.shape == (N, C, H, W)

    ref = _reference(x, ln_w, ln_b, w_in, b_in, wt, bt, w_out, b_out, grid_size)
    np.testing.assert_allclose(np.asarray(out), np.asarray(ref), atol=1e-4, rtol=1e-4)
    print("KERNEL_OK")
</pallas_src>

<mosaic_0001>
module attributes {stable_mosaic.version = 11 : i64} {
  func.func @_hit_kernel(%arg0: i32, %arg1: memref<1x8x256xf32, #tpu.memory_space<vmem>>, %arg2: memref<8x256xf32, #tpu.memory_space<vmem>>, %arg3: memref<8x256xf32, #tpu.memory_space<vmem>>, %arg4: memref<16x8xf32, #tpu.memory_space<vmem>>, %arg5: memref<16x1xf32, #tpu.memory_space<vmem>>, %arg6: memref<256x256xf32, #tpu.memory_space<vmem>>, %arg7: memref<256x256xf32, #tpu.memory_space<vmem>>, %arg8: memref<8x8xf32, #tpu.memory_space<vmem>>, %arg9: memref<8x8xf32, #tpu.memory_space<vmem>>, %arg10: memref<8x256xf32, #tpu.memory_space<vmem>>, %arg11: memref<1x8x256xf32, #tpu.memory_space<vmem>>) attributes {dimension_semantics = [#tpu.dimension_semantics<parallel>], iteration_bounds = array<i64: 2>, scalar_prefetch = 0 : i64, scratch_operands = 0 : i64, tpu.core_type = #tpu.core_type<tc>, window_params = [{transform_indices = @transform_0, window_bounds = array<i64: 1, 8, 256>}, {pipeline_mode = #tpu.pipeline_mode<synchronous>, transform_indices = @transform_1, window_bounds = array<i64: 8, 256>}, {pipeline_mode = #tpu.pipeline_mode<synchronous>, transform_indices = @transform_2, window_bounds = array<i64: 8, 256>}, {pipeline_mode = #tpu.pipeline_mode<synchronous>, transform_indices = @transform_3, window_bounds = array<i64: 16, 8>}, {pipeline_mode = #tpu.pipeline_mode<synchronous>, transform_indices = @transform_4, window_bounds = array<i64: 16, 1>}, {pipeline_mode = #tpu.pipeline_mode<synchronous>, transform_indices = @transform_5, window_bounds = array<i64: 256, 256>}, {pipeline_mode = #tpu.pipeline_mode<synchronous>, transform_indices = @transform_6, window_bounds = array<i64: 256, 256>}, {pipeline_mode = #tpu.pipeline_mode<synchronous>, transform_indices = @transform_7, window_bounds = array<i64: 8, 8>}, {pipeline_mode = #tpu.pipeline_mode<synchronous>, transform_indices = @transform_8, window_bounds = array<i64: 8, 8>}, {pipeline_mode = #tpu.pipeline_mode<synchronous>, transform_indices = @transform_9, window_bounds = array<i64: 8, 256>}, {transform_indices = @transform_10, window_bounds = array<i64: 1, 8, 256>}]} {
    %c0 = arith.constant 0 : index
    %c0_0 = arith.constant 0 : index
    %c0_1 = arith.constant 0 : index
    %0 = vector.load %arg1[%c0, %c0_0, %c0_1] : memref<1x8x256xf32, #tpu.memory_space<vmem>>, vector<1x8x256xf32>
    %1 = vector.shape_cast %0 : vector<1x8x256xf32> to vector<8x256xf32>
    %2 = vector.shape_cast %1 : vector<8x256xf32> to vector<1x8x256xf32>
    %cst = arith.constant dense<0.000000e+00> : vector<1xf32>
    %3 = vector.multi_reduction <add>, %2, %cst [1, 2] : vector<1x8x256xf32> to vector<1xf32>
    %4 = vector.shape_cast %3 : vector<1xf32> to vector<1x1x1xf32>
    %5 = vector.extract %4[0, 0, 0] : f32 from vector<1x1x1xf32>
    %6 = vector.broadcast %5 : f32 to vector<1x1xf32>
    %cst_2 = arith.constant 2.048000e+03 : f32
    %7 = vector.broadcast %cst_2 : f32 to vector<1x1xf32>
    %8 = arith.divf %6, %7 : vector<1x1xf32>
    %9 = vector.broadcast %8 : vector<1x1xf32> to vector<8x256xf32>
    %10 = arith.subf %1, %9 : vector<8x256xf32>
    %11 = arith.mulf %10, %10 : vector<8x256xf32>
    %12 = vector.shape_cast %11 : vector<8x256xf32> to vector<1x8x256xf32>
    %cst_3 = arith.constant dense<0.000000e+00> : vector<1xf32>
    %13 = vector.multi_reduction <add>, %12, %cst_3 [1, 2] : vector<1x8x256xf32> to vector<1xf32>
    %14 = vector.shape_cast %13 : vector<1xf32> to vector<1x1x1xf32>
    %15 = vector.extract %14[0, 0, 0] : f32 from vector<1x1x1xf32>
    %16 = vector.broadcast %15 : f32 to vector<1x1xf32>
    %cst_4 = arith.constant 2.048000e+03 : f32
    %17 = vector.broadcast %cst_4 : f32 to vector<1x1xf32>
    %18 = arith.divf %16, %17 : vector<1x1xf32>
    %19 = vector.broadcast %8 : vector<1x1xf32> to vector<8x256xf32>
    %20 = arith.subf %1, %19 : vector<8x256xf32>
    %cst_5 = arith.constant 9.99999974E-6 : f32
    %21 = vector.broadcast %cst_5 : f32 to vector<1x1xf32>
    %22 = arith.addf %18, %21 : vector<1x1xf32>
    %23 = math.rsqrt %22 : vector<1x1xf32>
    %24 = vector.broadcast %23 : vector<1x1xf32> to vector<8x256xf32>
    %25 = arith.mulf %20, %24 : vector<8x256xf32>
    %c0_6 = arith.constant 0 : index
    %c0_7 = arith.constant 0 : index
    %26 = vector.load %arg2[%c0_6, %c0_7] : memref<8x256xf32, #tpu.memory_space<vmem>>, vector<8x256xf32>
    %27 = arith.mulf %25, %26 : vector<8x256xf32>
    %c0_8 = arith.constant 0 : index
    %c0_9 = arith.constant 0 : index
    %28 = vector.load %arg3[%c0_8, %c0_9] : memref<8x256xf32, #tpu.memory_space<vmem>>, vector<8x256xf32>
    %29 = arith.addf %27, %28 : vector<8x256xf32>
    %c0_10 = arith.constant 0 : index
    %c0_11 = arith.constant 0 : index
    %30 = vector.load %arg4[%c0_10, %c0_11] : memref<16x8xf32, #tpu.memory_space<vmem>>, vector<16x8xf32>
    %cst_12 = arith.constant dense<0.000000e+00> : vector<16x256xf32>
    %31 = tpu.matmul %30, %29, %cst_12 {dimension_numbers = #tpu.dot_dimension_numbers<[1], [0], [0], [1], [0, 0, 1, 1], [], []>} : vector<16x8xf32>, vector<8x256xf32>, vector<16x256xf32> -> vector<16x256xf32>
    %c0_13 = arith.constant 0 : index
    %c0_14 = arith.constant 0 : index
    %32 = vector.load %arg5[%c0_13, %c0_14] : memref<16x1xf32, #tpu.memory_space<vmem>>, vector<16x1xf32>
    %33 = vector.broadcast %32 : vector<16x1xf32> to vector<16x256xf32>
    %34 = arith.addf %31, %33 : vector<16x256xf32>
    %cst_15 = arith.constant 5.000000e-01 : f32
    %35 = vector.broadcast %cst_15 : f32 to vector<16x256xf32>
    %36 = arith.mulf %35, %34 : vector<16x256xf32>
    %cst_16 = arith.constant 0.707106769 : f32
    %37 = vector.broadcast %cst_16 : f32 to vector<16x256xf32>
    %38 = arith.mulf %34, %37 : vector<16x256xf32>
    %cst_17 = arith.constant 0.000000e+00 : f32
    %39 = vector.broadcast %cst_17 : f32 to vector<16x256xf32>
    %40 = arith.cmpf oge, %38, %39 : vector<16x256xf32>
    %cst_18 = arith.constant 1.000000e+00 : f32
    %cst_19 = arith.constant -1.000000e+00 : f32
    %41 = vector.broadcast %cst_18 : f32 to vector<16x256xf32>
    %42 = vector.broadcast %cst_19 : f32 to vector<16x256xf32>
    %43 = arith.select %40, %41, %42 : vector<16x256xi1>, vector<16x256xf32>
    %44 = math.absf %38 : vector<16x256xf32>
    %cst_20 = arith.constant 0.327591091 : f32
    %45 = vector.broadcast %cst_20 : f32 to vector<16x256xf32>
    %46 = arith.mulf %45, %44 : vector<16x256xf32>
    %cst_21 = arith.constant 1.000000e+00 : f32
    %47 = vector.broadcast %cst_21 : f32 to vector<16x256xf32>
    %48 = arith.addf %47, %46 : vector<16x256xf32>
    %cst_22 = arith.constant 1.000000e+00 : f32
    %49 = vector.broadcast %cst_22 : f32 to vector<16x256xf32>
    %50 = arith.divf %49, %48 : vector<16x256xf32>
    %cst_23 = arith.constant 1.06140542 : f32
    %51 = vector.broadcast %cst_23 : f32 to vector<16x256xf32>
    %52 = arith.mulf %51, %50 : vector<16x256xf32>
    %cst_24 = arith.constant -1.45315206 : f32
    %53 = vector.broadcast %cst_24 : f32 to vector<16x256xf32>
    %54 = arith.addf %52, %53 : vector<16x256xf32>
    %55 = arith.mulf %54, %50 : vector<16x256xf32>
    %cst_25 = arith.constant 1.42141378 : f32
    %56 = vector.broadcast %cst_25 : f32 to vector<16x256xf32>
    %57 = arith.addf %55, %56 : vector<16x256xf32>
    %58 = arith.mulf %57, %50 : vector<16x256xf32>
    %cst_26 = arith.constant -0.284496725 : f32
    %59 = vector.broadcast %cst_26 : f32 to vector<16x256xf32>
    %60 = arith.addf %58, %59 : vector<16x256xf32>
    %61 = arith.mulf %60, %50 : vector<16x256xf32>
    %cst_27 = arith.constant 0.254829586 : f32
    %62 = vector.broadcast %cst_27 : f32 to vector<16x256xf32>
    %63 = arith.addf %61, %62 : vector<16x256xf32>
    %64 = arith.mulf %63, %50 : vector<16x256xf32>
    %cst_28 = arith.constant 0.000000e+00 : f32
    %65 = vector.broadcast %cst_28 : f32 to vector<16x256xf32>
    %66 = arith.subf %65, %44 : vector<16x256xf32>
    %67 = arith.mulf %66, %44 : vector<16x256xf32>
    %68 = math.exp %67 : vector<16x256xf32>
    %69 = arith.mulf %64, %68 : vector<16x256xf32>
    %cst_29 = arith.constant 1.000000e+00 : f32
    %70 = vector.broadcast %cst_29 : f32 to vector<16x256xf32>
    %71 = arith.subf %70, %69 : vector<16x256xf32>
    %72 = arith.mulf %43, %71 : vector<16x256xf32>
    %cst_30 = arith.constant 1.000000e+00 : f32
    %73 = vector.broadcast %cst_30 : f32 to vector<16x256xf32>
    %74 = arith.addf %73, %72 : vector<16x256xf32>
    %75 = arith.mulf %36, %74 : vector<16x256xf32>
    %76 = vector.extract_strided_slice %75 {offsets = [0, 0], sizes = [8, 256], strides = [1, 1]} : vector<16x256xf32> to vector<8x256xf32>
    %77 = vector.extract_strided_slice %75 {offsets = [8, 0], sizes = [8, 256], strides = [1, 1]} : vector<16x256xf32> to vector<8x256xf32>
    %c0_31 = arith.constant 0 : index
    %c0_32 = arith.constant 0 : index
    %78 = vector.load %arg6[%c0_31, %c0_32] : memref<256x256xf32, #tpu.memory_space<vmem>>, vector<256x256xf32>
    %cst_33 = arith.constant dense<0.000000e+00> : vector<8x256xf32>
    %79 = tpu.matmul %76, %78, %cst_33 {dimension_numbers = #tpu.dot_dimension_numbers<[1], [0], [0], [1], [0, 0, 1, 1], [], []>} : vector<8x256xf32>, vector<256x256xf32>, vector<8x256xf32> -> vector<8x256xf32>
    %c0_34 = arith.constant 0 : index
    %c0_35 = arith.constant 0 : index
    %80 = vector.load %arg7[%c0_34, %c0_35] : memref<256x256xf32, #tpu.memory_space<vmem>>, vector<256x256xf32>
    %cst_36 = arith.constant dense<0.000000e+00> : vector<8x256xf32>
    %81 = tpu.matmul %77, %80, %cst_36 {dimension_numbers = #tpu.dot_dimension_numbers<[1], [0], [0], [1], [0, 0, 1, 1], [], []>} : vector<8x256xf32>, vector<256x256xf32>, vector<8x256xf32> -> vector<8x256xf32>
    %c0_37 = arith.constant 0 : index
    %c0_38 = arith.constant 0 : index
    %82 = vector.load %arg8[%c0_37, %c0_38] : memref<8x8xf32, #tpu.memory_space<vmem>>, vector<8x8xf32>
    %cst_39 = arith.constant dense<0.000000e+00> : vector<8x256xf32>
    %83 = tpu.matmul %82, %79, %cst_39 {dimension_numbers = #tpu.dot_dimension_numbers<[1], [0], [0], [1], [0, 0, 1, 1], [], []>} : vector<8x8xf32>, vector<8x256xf32>, vector<8x256xf32> -> vector<8x256xf32>
    %c0_40 = arith.constant 0 : index
    %c0_41 = arith.constant 0 : index
    %84 = vector.load %arg9[%c0_40, %c0_41] : memref<8x8xf32, #tpu.memory_space<vmem>>, vector<8x8xf32>
    %cst_42 = arith.constant dense<0.000000e+00> : vector<8x256xf32>
    %85 = tpu.matmul %84, %81, %cst_42 {dimension_numbers = #tpu.dot_dimension_numbers<[1], [0], [0], [1], [0, 0, 1, 1], [], []>} : vector<8x8xf32>, vector<8x256xf32>, vector<8x256xf32> -> vector<8x256xf32>
    %86 = arith.addf %83, %85 : vector<8x256xf32>
    %c0_43 = arith.constant 0 : index
    %c0_44 = arith.constant 0 : index
    %87 = vector.load %arg10[%c0_43, %c0_44] : memref<8x256xf32, #tpu.memory_space<vmem>>, vector<8x256xf32>
    %88 = arith.addf %86, %87 : vector<8x256xf32>
    %c0_45 = arith.constant 0 : index
    %c0_46 = arith.constant 0 : index
    %c0_47 = arith.constant 0 : index
    %89 = vector.load %arg11[%c0_45, %c0_46, %c0_47] : memref<1x8x256xf32, #tpu.memory_space<vmem>>, vector<1x8x256xf32>
    %90 = vector.shape_cast %89 : vector<1x8x256xf32> to vector<8x256xf32>
    %91 = vector.shape_cast %88 : vector<8x256xf32> to vector<1x8x256xf32>
    tpu.vector_store %arg11[%c0_45, %c0_46, %c0_47], %91 {strides = array<i32>} : memref<1x8x256xf32, #tpu.memory_space<vmem>>, vector<1x8x256xf32>,
    return
  }
  func.func @transform_0(%arg0: i32) -> (i32, i32, i32) {
    %c0_i32 = arith.constant 0 : i32
    %c0_i32_0 = arith.constant 0 : i32
    %c0_i32_1 = arith.constant 0 : i32
    return %arg0, %c0_i32, %c0_i32_0 : i32, i32, i32
  }
  func.func @transform_1(%arg0: i32) -> (i32, i32) {
    %c0_i32 = arith.constant 0 : i32
    %c0_i32_0 = arith.constant 0 : i32
    %c0_i32_1 = arith.constant 0 : i32
    return %c0_i32, %c0_i32_0 : i32, i32
  }
  func.func @transform_2(%arg0: i32) -> (i32, i32) {
    %c0_i32 = arith.constant 0 : i32
    %c0_i32_0 = arith.constant 0 : i32
    %c0_i32_1 = arith.constant 0 : i32
    return %c0_i32, %c0_i32_0 : i32, i32
  }
  func.func @transform_3(%arg0: i32) -> (i32, i32) {
    %c0_i32 = arith.constant 0 : i32
    %c0_i32_0 = arith.constant 0 : i32
    %c0_i32_1 = arith.constant 0 : i32
    return %c0_i32, %c0_i32_0 : i32, i32
  }
  func.func @transform_4(%arg0: i32) -> (i32, i32) {
    %c0_i32 = arith.constant 0 : i32
    %c0_i32_0 = arith.constant 0 : i32
    %c0_i32_1 = arith.constant 0 : i32
    return %c0_i32, %c0_i32_0 : i32, i32
  }
  func.func @transform_5(%arg0: i32) -> (i32, i32) {
    %c0_i32 = arith.constant 0 : i32
    %c0_i32_0 = arith.constant 0 : i32
    %c0_i32_1 = arith.constant 0 : i32
    return %c0_i32, %c0_i32_0 : i32, i32
  }
  func.func @transform_6(%arg0: i32) -> (i32, i32) {
    %c0_i32 = arith.constant 0 : i32
    %c0_i32_0 = arith.constant 0 : i32
    %c0_i32_1 = arith.constant 0 : i32
    return %c0_i32, %c0_i32_0 : i32, i32
  }
  func.func @transform_7(%arg0: i32) -> (i32, i32) {
    %c0_i32 = arith.constant 0 : i32
    %c0_i32_0 = arith.constant 0 : i32
    %c0_i32_1 = arith.constant 0 : i32
    return %c0_i32, %c0_i32_0 : i32, i32
  }
  func.func @transform_8(%arg0: i32) -> (i32, i32) {
    %c0_i32 = arith.constant 0 : i32
    %c0_i32_0 = arith.constant 0 : i32
    %c0_i32_1 = arith.constant 0 : i32
    return %c0_i32, %c0_i32_0 : i32, i32
  }
  func.func @transform_9(%arg0: i32) -> (i32, i32) {
    %c0_i32 = arith.constant 0 : i32
    %c0_i32_0 = arith.constant 0 : i32
    %c0_i32_1 = arith.constant 0 : i32
    return %c0_i32, %c0_i32_0 : i32, i32
  }
  func.func @transform_10(%arg0: i32) -> (i32, i32, i32) {
    %c0_i32 = arith.constant 0 : i32
    %c0_i32_0 = arith.constant 0 : i32
    %c0_i32_1 = arith.constant 0 : i32
    return %arg0, %c0_i32, %c0_i32_0 : i32, i32, i32
  }
}

</mosaic_0001>

<bundles_post_ra>
// kernel: tpu_custom_call.1
= control target key start
LH: loop header
LB: loop body
LE: loop exit
PB: predicated region body
PF: predicated region fallthrough
CT: control target
= control target key end

     0   :  { %s2064_s0 = inlined_call_operand.vmem [shape: f32[2,8,256], index: 0, kind: input, shape index: {}]   ;;  %s2065_s1 = inlined_call_operand.hbm [shape: f32[8,256], index: 1, kind: input, shape index: {}]   ;;  %s2066_s2 = inlined_call_operand.hbm [shape: f32[8,256], index: 2, kind: input, shape index: {}]   ;;  %s2067_s3 = inlined_call_operand.vmem [shape: f32[16,8], index: 3, kind: input, shape index: {}]   ;;  %s2068_s4 = inlined_call_operand.vmem [shape: f32[16,1], index: 4, kind: input, shape index: {}]   ;;  %s2069_s5 = inlined_call_operand.hbm [shape: f32[256,256], index: 5, kind: input, shape index: {}]   ;;  %s2070_s6 = inlined_call_operand.hbm [shape: f32[256,256], index: 6, kind: input, shape index: {}]   ;;  %s2071_s7 = inlined_call_operand.hbm [shape: f32[8,8], index: 7, kind: input, shape index: {}]   ;;  %s2072_s8 = inlined_call_operand.hbm [shape: f32[8,8], index: 8, kind: input, shape index: {}]   ;;  %s2073_s9 = inlined_call_operand.vmem [shape: f32[8,256], index: 9, kind: input, shape index: {}]   ;;  %s2074_s10 = inlined_call_operand.hbm [shape: f32[2,8,256], index: 10, kind: output, shape index: {}]  }
   0x1   :  { %2078 = sst [smem:[#allocation22_spill]] %s2065_s1 }
   0x2   :  { %2079 = sst [smem:[#allocation23_spill]] %s2066_s2 }
   0x3   :  { %2080 = sst [smem:[#allocation24_spill]] %s2070_s6 }
   0x4   :  { %15 = vsyncpa [#allocation3], 0 }
   0x5   :  { %16 = vsyncpa [#allocation6], 0 }
   0x6   :  { %17 = vsyncpa [#allocation9], 0 }
   0x7   :  { %18 = vsyncpa [#allocation12], 0 }
   0x8   :  { %19 = vsyncpa [#allocation4], 0 }
   0x9   :  { %21 = vsyncpa [#allocation4 + $0x1], 0  ;;  %s1744_s13 = smov 0   ;;  %s1746_s14 = smov 0  }
   0xa   :  { %s1748_s15 = smov 0   ;;  %s1750_s16 = smov 0  }
   0xb LB: > { %2081 = sst [smem:[#allocation19_spill]] %s1672_s15  ;;  %s1765_s17 = sadd.s32 4294967295, %s1676_s16   ;;  %s1676_s16 = sphi %s1750_s16, %s2095_s16   ;;  %s1672_s15 = sphi %s1748_s15, %s2097_s15   ;;  %s1668_s14 = sphi %s1746_s14, %s2099_s14   ;;  %s1664_s13 = sphi %s1744_s13, %s2098_s13  }
   0xc   : > { %s1253_s18 = sadd.s32 4294967294, %s1676_s16   ;;  %s1769_s19 = sadd.s32 1, %s1676_s16  }
   0xd   : > { %2082 = sst [smem:[#allocation20_spill]] %s1769_s19  ;;  %s249_s20 = sadd.s32 1, %s1672_s15 }
   0xe   : > { %s246_s21 = ssub.s32 %s1676_s16, %s1769_s19  ;;  %p259_p0 = scmp.ne.s32.totalorder %s1672_s15, %s1668_s14 }
   0xf   : > { %p247_p1 = scmp.eq.s32.totalorder %s246_s21, 0  ;;  %p260_p2 = scmp.eq.s32.totalorder %s1765_s17, 1 }
  0x10   : > { %p265_p3 = scmp.ne.s32.totalorder %s1668_s14, %s1664_s13  ;;  %p266_p4 = scmp.eq.s32.totalorder %s1253_s18, 1 }
  0x11   : > { %s1780_s22 = scalar_select %p247_p1, %s1672_s15, %s249_s20  }
  0x12   : > { %p1782_p5 = por %p260_p2, %p259_p0  ;;  %p1786_p6 = por %p266_p4, %p265_p3 }
  0x13   : > { %2083 = sst [smem:[#allocation21_spill]] %s1780_s22  ;;  %p1254_p7 = scmp.ge.s32.totalorder %s1676_s16, 1 }
  0x14   : > { %p273_p8 = scmp.lt.s32.totalorder %s1676_s16, 3  ;;  %p1340_p9 = scmp.eq.s32.totalorder %s1765_s17, 0 }
  0x15   : > { %s2087_s2 = sld [smem:[#allocation23_spill]]  ;;  %s1678_s29 = smov [#allocation5]  }
  0x16   : > { %p1793_p10 = pnand %p1254_p7, %p273_p8  ;;  %s299_s30 = sshll.u32 %s1678_s29, 4  ;;  %s300_s30 = int_to_ptr.vmem [resolvable:$true] %s299_s30 }
  0x17   : > { %s2089_s6 = sld [smem:[#allocation24_spill]]  ;;  %s1679_s21 = smov [#allocation8]  }
  0x18   : > { %p1317_p11 = pneg %p1793_p10  ;;  %s330_s26 = sshll.u32 %s1679_s21, 4  ;;  %s331_s26 = int_to_ptr.vmem [resolvable:$true] %s330_s26 }
  0x19   : > { %s2090_s1 = sld [smem:[#allocation22_spill]]  ;;  %s1680_s22 = smov 256  }
  0x1a   : > { %p1804_p12 = pnand %p1340_p9, %p1317_p11  ;;  %s1681_s15 = smov 16  }
  0x1b   : > { %s297_s28 = sshll.u32 %s2087_s2, 4  ;;  %s1682_s19 = smov [#allocation2]   ;;  %s298_s28 = int_to_ptr.hbm [resolvable:$true] %s297_s28 }
  0x1c   : > { %1323 = dma.hbm_to_vmem [thread:$0]  (!%p1804_p12), %s298_s28, 256, %s300_s30, [#allocation6]  }
  0x1d   : > { %s328_s20 = sshll.u32 %s2089_s6, 4  ;;  %s314_s6 = sshll.u32 %s2069_s5, 4  ;;  %s329_s20 = int_to_ptr.hbm [resolvable:$true] %s328_s20  ;;  %s315_s6 = int_to_ptr.hbm [resolvable:$true] %s314_s6 }
  0x1e   : > { %1329 = dma.hbm_to_vmem [thread:$0]  (!%p1804_p12), %s329_s20, 8192, %s331_s26, [#allocation9], %s1680_s22, %s1680_s22, %s1681_s15  }
  0x1f   : > { %s285_s2 = sshll.u32 %s2090_s1, 4  ;;  %s287_s28 = sshll.u32 %s1682_s19, 4  ;;  %s286_s2 = int_to_ptr.hbm [resolvable:$true] %s285_s2  ;;  %s288_s28 = int_to_ptr.vmem [resolvable:$true] %s287_s28 }
  0x20   : > { %1320 = dma.hbm_to_vmem [thread:$0]  (!%p1804_p12), %s286_s2, 256, %s288_s28, [#allocation3]  }
  0x21   : > { %s1683_s30 = smov [#allocation7]   ;;  %s343_s1 = sshll.u32 %s2071_s7, 4  ;;  %s344_s1 = int_to_ptr.hbm [resolvable:$true] %s343_s1 }
  0x22   : > { %s316_s21 = sshll.u32 %s1683_s30, 4  ;;  %s355_s12 = sshll.u32 %s2072_s8, 4  ;;  %s317_s21 = int_to_ptr.vmem [resolvable:$true] %s316_s21  ;;  %s356_s12 = int_to_ptr.hbm [resolvable:$true] %s355_s12 }
  0x23   : > { %1326 = dma.hbm_to_vmem [thread:$0]  (!%p1804_p12), %s315_s6, 8192, %s317_s21, [#allocation6], %s1680_s22, %s1680_s22, %s1681_s15  }
  0x24   : > { %s1684_s19 = smov [#allocation10]   ;;  %s1685_s2 = smov [#allocation11]  }
  0x25   : > { %s345_s18 = sshll.u32 %s1684_s19, 4  ;;  %s357_s28 = sshll.u32 %s1685_s2, 4  ;;  %s346_s18 = int_to_ptr.vmem [resolvable:$true] %s345_s18  ;;  %s358_s28 = int_to_ptr.vmem [resolvable:$true] %s357_s28 }
  0x26   : > { %1332 = dma.hbm_to_vmem [thread:$0]  (!%p1804_p12), %s344_s1, 128, %s346_s18, [#allocation9]  }
  0x27   : > { %1335 = dma.hbm_to_vmem [thread:$0]  (!%p1804_p12), %s356_s12, 128, %s358_s28, [#allocation12]  }
  0x28   : > { %381 = sbr.rel (%p1793_p10) target bundleno = 920 (0x398), region = 60 }
  0x2d   : > { %1643 = dma.done.wait (%p1340_p9), [#allocation3], 256  }
  0x2e   : > { %1645 = vsyncadd (%p1340_p9), [#allocation3], 4294967040 }
  0x2f   : > { %1647 = dma.done.wait (%p1340_p9), [#allocation6], 8448  }
  0x30   : > { %1649 = vsyncadd (%p1340_p9), [#allocation6], 4294958848 }
  0x31   : > { %1651 = dma.done.wait (%p1340_p9), [#allocation9], 8320  }
  0x32   : > { %1653 = vsyncadd (%p1340_p9), [#allocation9], 4294958976 }
  0x33   : > { %1655 = dma.done.wait (%p1340_p9), [#allocation12], 128  }
  0x34   : > { %1657 = vsyncadd (%p1340_p9), [#allocation12], 4294967168  ;;  %p445_p13 = scmp.lt.s32.totalorder %s1765_s17, 1  ;;  %v1686_v10 = vmov 2048.0   ;;  %v510_v31 = vld [vmem:[%s2068_s4] sm:$0xff]  ;;  %v1687_v32 = vmov 0  }
  0x35   : > { %1398 = vrcp.f32 %v1686_v10  ;;  %1396 = vset.pattern.permute.xlu1 %v1687_v32  ;;  %1397 = vset.pattern.permute.xlu0 %v1687_v32  ;;  %v511_v36 = vld [vmem:[%s2068_s4 + $0x8] sm:$0xff]  ;;  %v500_v44 = vld [vmem:[#allocation2] sm:$0xff]  ;;  %v504_v48 = vld [vmem:[#allocation5] sm:$0xff]  ;;  %vm522_vm4 = vcmask 64512   ;;  %s442_s2 = sand.u32 1, %s1668_s14   ;;  %s1286_s15 = sshll.u32 %s1765_s17, 4 }
  0x36   : > { %s446_s1 = scalar_select %p445_p13, %s1765_s17, 1  ;;  %514 = vperm.xlu1 %1396, %v510_v31   ;;  %v501_v45 = vld [vmem:[#allocation2 + $0x8] sm:$0xff]  ;;  %v505_v49 = vld [vmem:[#allocation5 + $0x8] sm:$0xff]  ;;  %v508_v54 = vld [vmem:[%s2067_s3] sm:$0xff] }
  0x37   : > { %v509_v55 = vld [vmem:[%s2067_s3 + $0x8] sm:$0xff]  ;;  %v765_v56 = vld [vmem:[#allocation7 + $0xf0] sm:$0xff]  ;;  %v766_v58 = vld [vmem:[#allocation7 + $0xf8] sm:$0xff]  ;;  %s1269_s28 = sshll.u32 %s442_s2, 4  ;;  %s1118_s17 = scalar_lea.sflag [#allocation4], %s442_s2 }
  0x38   : > { %s1285_s6 = sshll.u32 %s446_s1, 4  ;;  %v797_v57 = vld [vmem:[#allocation7 + $0x1f0] sm:$0xff]  ;;  %799 = vmatpush.msra.mxu2 %v765_v56  ;;  %v798_v59 = vld [vmem:[#allocation7 + $0x1f8] sm:$0xff]  ;;  %v763_v60 = vld [vmem:[#allocation7 + $0xe0] sm:$0xff]  ;;  %s444_s30 = scalar_lea.vmem [#allocation13], %s1269_s28 }
  0x39   : > { %s449_s25 = scalar_lea.vmem %s2064_s0, %s1285_s6  ;;  %819 = vmatpush.msra.mxu3 %v797_v57  ;;  %v795_v61 = vld [vmem:[#allocation7 + $0x1e0] sm:$0xff]  ;;  %v764_v62 = vld [vmem:[#allocation7 + $0xe8] sm:$0xff]  ;;  %v758_v10 = vld [vmem:[#allocation7 + $0xb8] sm:$0xff]  ;;  %s1131_s29 = sshll.u32 %s444_s30, 4  ;;  %s1132_s29 = int_to_ptr.vmem [resolvable:$true] %s1131_s29 }
  0x3a   : > { %v450_v0 = vld [vmem:[%s449_s25] sm:$0xff]  ;;  %v451_v1 = vld [vmem:[%s449_s25 + $0x8] sm:$0xff]  ;;  %800 = vmatpush.msra.mxu2 %v763_v60  ;;  %v745_v32 = vld [vmem:[#allocation7 + $0x50] sm:$0xff]  ;;  %s1618_s28 = scalar_lea.hbm %s2074_s10, 32 }
  0x3b   : > { %v452_v2 = vadd.f32 %v451_v1, %v450_v0  ;;  %v1399_v11 = vpop.eup %1398  ;;  %820 = vmatpush.msra.mxu3 %v795_v61  ;;  %v796_v63 = vld [vmem:[#allocation7 + $0x1e8] sm:$0xff]  ;;  %v770_v56 = vld [vmem:[#allocation7 + $0x118] sm:$0xff]  ;;  %v735_v57 = vld [vmem:[#allocation7] sm:$0xff] }
  0x3c   : > { %v464_v12 = vmul.f32 2048.0, %v1399_v11  ;;  %vm468_vm0 = vweird.f32 %v1399_v11  ;;  %v780_v31 = vld [vmem:[#allocation7 + $0x168] sm:$0xff]  ;;  %v909_v61 = vld [vmem:[#allocation8 + $0xf0] sm:$0xff] }
  0x3d   : > { %453 = vadd.xlane.f32.xlu0 %v452_v2  ;;  %v762_v2 = vld [vmem:[#allocation7 + $0xd8] sm:$0xff]  ;;  %v768_v60 = vld [vmem:[#allocation7 + $0x108] sm:$0xff] }
  0x3e   : > { %v465_v13 = vsub.f32 1.0, %v464_v12  ;;  %519 = vperm.xlu1 %1396, %v511_v36   ;;  %v755_v12 = vld [vmem:[#allocation7 + $0xa0] sm:$0xff] }
  0x3f   : > { %v743_v36 = vld [vmem:[#allocation7 + $0x40] sm:$0xff] }
  0x40   : > { %v466_v14 = vmul.f32 %v1399_v11, %v465_v13  ;;  %v787_v13 = vld [vmem:[#allocation7 + $0x1a0] sm:$0xff] }
  0x42   : > { %v467_v15 = vadd.f32 %v1399_v11, %v466_v14  ;;  %v756_v14 = vld [vmem:[#allocation7 + $0xa8] sm:$0xff] }
  0x44   : > { %v469_v16 = vsel %vm468_vm0, %v1399_v11, %v467_v15  ;;  %v790_v11 = vld [vmem:[#allocation7 + $0x1b8] sm:$0xff]  ;;  %v788_v15 = vld [vmem:[#allocation7 + $0x1a8] sm:$0xff] }
  0xb0   : > { %v454_v3 = vpop.xlane.xlu0 %453 }
  0xb1   : > { %v455_v4 = vrot.slane %v454_v3, 4 }
  0xb3   : > { %v456_v5 = vadd.f32 %v455_v4, %v454_v3  ;;  %v794_v3 = vld [vmem:[#allocation7 + $0x1d8] sm:$0xff]  ;;  %v759_v4 = vld [vmem:[#allocation7 + $0xc0] sm:$0xff] }
  0xb5   : > { %v457_v6 = vrot.slane %v456_v5, 2 }
  0xb7   : > { %v458_v7 = vadd.f32 %v457_v6, %v456_v5  ;;  %v791_v5 = vld [vmem:[#allocation7 + $0x1c0] sm:$0xff]  ;;  %v760_v6 = vld [vmem:[#allocation7 + $0xc8] sm:$0xff] }
  0xb9   : > { %v459_v8 = vrot.slane %v458_v7, 1 }
  0xbb   : > { %v460_v9 = vadd.f32 %v459_v8, %v458_v7  ;;  %v792_v7 = vld [vmem:[#allocation7 + $0x1c8] sm:$0xff]  ;;  %v757_v8 = vld [vmem:[#allocation7 + $0xb0] sm:$0xff] }
  0xbd   : > { %1287 = vpush %v460_v9  ;;  %v789_v9 = vld [vmem:[#allocation7 + $0x1b0] sm:$0xff] }
  0xee   : > { %s1288_s11 = spop %1287 }
  0xef   : > { %v462_v17 = vstv %s1288_s11  ;;  %s1129_s11 = scalar_lea.hbm %s2074_s10, %s1286_s15 }
  0xf0   : > { %v470_v18 = vmul.f32 %v469_v16, %v462_v17  ;;  %v785_v17 = vld [vmem:[#allocation7 + $0x190] sm:$0xff]  ;;  %s1133_s20 = sshll.u32 %s1129_s11, 4  ;;  %s1134_s20 = int_to_ptr.hbm [resolvable:$true] %s1133_s20 }
  0xf1   : > { %s1612_s26 = sshra.s32 %s1134_s20, 4  ;;  %s1613_s26 = int_to_ptr.hbm [resolvable:$true] %s1612_s26 }
  0xf2   : > { %v471_v19 = vsub.f32 %v450_v0, %v470_v18  ;;  %v472_v20 = vsub.f32 %v451_v1, %v470_v18  ;;  %v761_v0 = vld [vmem:[#allocation7 + $0xd0] sm:$0xff]  ;;  %v754_v18 = vld [vmem:[#allocation7 + $0x98] sm:$0xff]  ;;  %s1614_s12 = scalar_lea.hbm %s1613_s26, 16  ;;  %p1619_p3 = scmp.lt.s32.totalorder %s1613_s26, %s2074_s10 }
  0xf3   : > { %v793_v1 = vld [vmem:[#allocation7 + $0x1d0] sm:$0xff]  ;;  %801 = vmatpush.msra.mxu2 %v761_v0  ;;  %p1615_p0 = scmp.ne.s32.totalorder %s1613_s26, %s1614_s12  ;;  %p1620_p4 = scmp.lt.s32.totalorder %s1618_s28, %s1614_s12 }
  0xf4   : > { %v473_v21 = vmul.f32 %v471_v19, %v471_v19  ;;  %v474_v22 = vmul.f32 %v472_v20, %v472_v20  ;;  %821 = vmatpush.msra.mxu3 %v793_v1  ;;  %v941_v0 = vld [vmem:[#allocation8 + $0x1f0] sm:$0xff]  ;;  %v910_v1 = vld [vmem:[#allocation8 + $0xf8] sm:$0xff] }
  0xf5   : > { %802 = vmatpush.msra.mxu2 %v759_v4  ;;  %p1616_p1 = pnand %p1615_p0, %p1782_p5  ;;  %p1621_p7 = por %p1620_p4, %p1619_p3 }
  0xf6   : > { %v475_v23 = vadd.f32 %v474_v22, %v473_v21  ;;  %822 = vmatpush.msra.mxu3 %v791_v5  ;;  %v783_v21 = vld [vmem:[#allocation7 + $0x180] sm:$0xff]  ;;  %v752_v22 = vld [vmem:[#allocation7 + $0x88] sm:$0xff] }
  0xf7   : > { %803 = vmatpush.msra.mxu2 %v757_v8  ;;  %v907_v5 = vld [vmem:[#allocation8 + $0xe0] sm:$0xff]  ;;  %p1617_p2 = pneg %p1616_p1 }
  0xf8   : > { %476 = vadd.xlane.f32.xlu0 %v475_v23  ;;  %823 = vmatpush.msra.mxu3 %v789_v9  ;;  %v784_v23 = vld [vmem:[#allocation7 + $0x188] sm:$0xff] }
  0xf9   : > { %804 = vmatpush.msra.mxu2 %v755_v12  ;;  %v940_v12 = vld [vmem:[#allocation8 + $0x1e8] sm:$0xff]  ;;  %p1622_p8 = pnand %p1621_p7, %p1617_p2 }
  0xfa   : > { %824 = vmatpush.msra.mxu3 %v787_v13  ;;  %v905_v13 = vld [vmem:[#allocation8 + $0xd0] sm:$0xff] }
  0xfc   : > { %825 = vmatpush.msra.mxu3 %v785_v17 }
  0xfe   : > { %826 = vmatpush.msra.mxu3 %v783_v21 }
 0x16b   : > { %v477_v24 = vpop.xlane.xlu0 %476 }
 0x16c   : > { %v478_v25 = vrot.slane %v477_v24, 4 }
 0x16e   : > { %v479_v26 = vadd.f32 %v478_v25, %v477_v24  ;;  %v749_v24 = vld [vmem:[#allocation7 + $0x70] sm:$0xff] }
 0x16f   : > { %v781_v25 = vld [vmem:[#allocation7 + $0x170] sm:$0xff] }
 0x170   : > { %v480_v27 = vrot.slane %v479_v26, 2  ;;  %827 = vmatpush.msra.mxu3 %v781_v25  ;;  %v936_v25 = vld [vmem:[#allocation8 + $0x1c8] sm:$0xff] }
 0x172   : > { %v481_v28 = vadd.f32 %v480_v27, %v479_v26  ;;  %v750_v26 = vld [vmem:[#allocation7 + $0x78] sm:$0xff] }
 0x173   : > { %v782_v27 = vld [vmem:[#allocation7 + $0x178] sm:$0xff] }
 0x174   : > { %v482_v29 = vrot.slane %v481_v28, 1 }
 0x176   : > { %v483_v30 = vadd.f32 %v482_v29, %v481_v28  ;;  %v747_v28 = vld [vmem:[#allocation7 + $0x60] sm:$0xff] }
 0x177   : > { %v779_v29 = vld [vmem:[#allocation7 + $0x160] sm:$0xff] }
 0x178   : > { %1289 = vpush %v483_v30  ;;  %v748_v30 = vld [vmem:[#allocation7 + $0x68] sm:$0xff]  ;;  %828 = vmatpush.msra.mxu3 %v779_v29  ;;  %v902_v29 = vld [vmem:[#allocation8 + $0xb8] sm:$0xff] }
 0x1a9   : > { %s1290_s27 = spop %1289 }
 0x1aa   : > { %v485_v33 = vstv %s1290_s27 }
 0x1ab   : > { %v486_v34 = vmul.f32 %v485_v33, %v469_v16  ;;  %v753_v16 = vld [vmem:[#allocation7 + $0x90] sm:$0xff] }
 0x1ac   : > { %805 = vmatpush.msra.mxu2 %v753_v16  ;;  %v777_v33 = vld [vmem:[#allocation7 + $0x150] sm:$0xff] }
 0x1ad   : > { %v487_v35 = vadd.f32 1e-05, %v486_v34  ;;  %v746_v34 = vld [vmem:[#allocation7 + $0x58] sm:$0xff]  ;;  %829 = vmatpush.msra.mxu3 %v777_v33  ;;  %v931_v33 = vld [vmem:[#allocation8 + $0x1a0] sm:$0xff] }
 0x1af   : > { %1400 = vrsqrt.f32 %v487_v35  ;;  %vm494_vm2 = vweird.f32 %v487_v35 }
 0x1b5   : > { %v1401_v37 = vpop.eup %1400 }
 0x1b6   : > { %v489_v38 = vmul.f32 %v1401_v37, %v487_v35  ;;  %vm495_vm1 = vweird.f32 %v1401_v37  ;;  %v778_v35 = vld [vmem:[#allocation7 + $0x158] sm:$0xff] }
 0x1b7   : > { %vm496_vm3 = vmor %vm494_vm2, %vm495_vm1 }
 0x1b8   : > { %v490_v39 = vmul.f32 %v1401_v37, %v489_v38  ;;  %v744_v38 = vld [vmem:[#allocation7 + $0x48] sm:$0xff] }
 0x1ba   : > { %v491_v40 = vmul.f32 0.5, %v490_v39  ;;  %v776_v39 = vld [vmem:[#allocation7 + $0x148] sm:$0xff] }
 0x1bc   : > { %v492_v41 = vsub.f32 1.5, %v491_v40  ;;  %v741_v40 = vld [vmem:[#allocation7 + $0x30] sm:$0xff] }
 0x1be   : > { %v493_v42 = vmul.f32 %v1401_v37, %v492_v41  ;;  %v773_v41 = vld [vmem:[#allocation7 + $0x130] sm:$0xff] }
 0x1c0   : > { %v497_v43 = vsel %vm496_vm3, %v1401_v37, %v493_v42  ;;  %v775_v37 = vld [vmem:[#allocation7 + $0x140] sm:$0xff]  ;;  %v742_v42 = vld [vmem:[#allocation7 + $0x38] sm:$0xff] }
 0x1c1   : > { %v498_v46 = vmul.f32 %v497_v43, %v471_v19  ;;  %v499_v47 = vmul.f32 %v497_v43, %v472_v20  ;;  %v786_v19 = vld [vmem:[#allocation7 + $0x198] sm:$0xff]  ;;  %v751_v20 = vld [vmem:[#allocation7 + $0x80] sm:$0xff]  ;;  %830 = vmatpush.msra.mxu3 %v775_v37  ;;  %v897_v37 = vld [vmem:[#allocation8 + $0x90] sm:$0xff] }
 0x1c2   : > { %806 = vmatpush.msra.mxu2 %v751_v20  ;;  %v774_v43 = vld [vmem:[#allocation7 + $0x138] sm:$0xff]  ;;  %v903_v20 = vld [vmem:[#allocation8 + $0xc0] sm:$0xff] }
 0x1c3   : > { %v502_v50 = vmul.f32 %v500_v44, %v498_v46  ;;  %v503_v51 = vmul.f32 %v501_v45, %v499_v47  ;;  %831 = vmatpush.msra.mxu3 %v773_v41  ;;  %v739_v44 = vld [vmem:[#allocation7 + $0x20] sm:$0xff]  ;;  %v740_v46 = vld [vmem:[#allocation7 + $0x28] sm:$0xff]  ;;  %v515_v47 = vpop.permute.xlu1 %514 }
 0x1c4   : > { %807 = vmatpush.msra.mxu2 %v749_v24  ;;  %v771_v45 = vld [vmem:[#allocation7 + $0x120] sm:$0xff]  ;;  %v904_v24 = vld [vmem:[#allocation8 + $0xc8] sm:$0xff] }
 0x1c5   : > { %v506_v52 = vadd.f32 %v504_v48, %v502_v50  ;;  %v507_v53 = vadd.f32 %v505_v49, %v503_v51  ;;  %832 = vmatpush.msra.mxu3 %v771_v45  ;;  %v772_v48 = vld [vmem:[#allocation7 + $0x128] sm:$0xff]  ;;  %v737_v51 = vld [vmem:[#allocation7 + $0x10] sm:$0xff] }
 0x1c6   : > { %808 = vmatpush.msra.mxu2 %v747_v28 }
 0x1c7   : > { %544 = vmatpush.msra.mxu0 %v506_v52  ;;  %567 = vmatpush.msra.mxu1 %v507_v53  ;;  %v769_v52 = vld [vmem:[#allocation7 + $0x110] sm:$0xff]  ;;  %v738_v53 = vld [vmem:[#allocation7 + $0x18] sm:$0xff] }
 0x1c8   : > { %1272 = vmatmul.msk.f32.vlgmr.msra.gmra.mxu0 %vm522_vm4, %v508_v54  ;;  %1274 = vmatmul.msk.f32.vlgmr.msra.gmra.mxu1 %vm522_vm4, %v508_v54 }
 0x1c9   : > { %839 = vmatpush.msrb.mxu0 %v766_v58  ;;  %859 = vmatpush.msrb.mxu1 %v798_v59  ;;  %v767_v58 = vld [vmem:[#allocation7 + $0x100] sm:$0xff]  ;;  %v736_v59 = vld [vmem:[#allocation7 + $0x8] sm:$0xff] }
 0x1ca   : > { %809 = vmatpush.msra.mxu2 %v745_v32  ;;  %833 = vmatpush.msra.mxu3 %v769_v52  ;;  %v899_v32 = vld [vmem:[#allocation8 + $0xa0] sm:$0xff]  ;;  %v928_v52 = vld [vmem:[#allocation8 + $0x188] sm:$0xff] }
 0x1cb   : > { %840 = vmatpush.msrb.mxu0 %v764_v62  ;;  %860 = vmatpush.msrb.mxu1 %v796_v63 }
 0x1cc   : > { %810 = vmatpush.msra.mxu2 %v743_v36  ;;  %834 = vmatpush.msra.mxu3 %v767_v58  ;;  %v932_v36 = vld [vmem:[#allocation8 + $0x1a8] sm:$0xff] }
 0x1cd   : > { %841 = vmatpush.msrb.mxu0 %v762_v2  ;;  %861 = vmatpush.msrb.mxu1 %v794_v3  ;;  %v942_v2 = vld [vmem:[#allocation8 + $0x1f8] sm:$0xff] }
 0x1ce   : > { %811 = vmatpush.msra.mxu2 %v741_v40  ;;  %963 = vmatpush.msrb.mxu3 %v941_v0  ;;  %v898_v40 = vld [vmem:[#allocation8 + $0x98] sm:$0xff] }
 0x1cf   : > { %842 = vmatpush.msrb.mxu0 %v760_v6  ;;  %862 = vmatpush.msrb.mxu1 %v792_v7  ;;  %v939_v6 = vld [vmem:[#allocation8 + $0x1e0] sm:$0xff]  ;;  %v908_v7 = vld [vmem:[#allocation8 + $0xe8] sm:$0xff]  ;;  %v926_v0 = vld [vmem:[#allocation8 + $0x178] sm:$0xff] }
 0x1d0   : > { %1273 = vmatmul.msk.f32.gmra.mxu0 %vm522_vm4, %v509_v55  ;;  %1275 = vmatmul.msk.f32.gmra.mxu1 %vm522_vm4, %v509_v55 }
 0x1d1   : > { %843 = vmatpush.msrb.mxu0 %v758_v10  ;;  %863 = vmatpush.msrb.mxu1 %v790_v11 }
 0x1d2   : > { %812 = vmatpush.msra.mxu2 %v739_v44  ;;  %964 = vmatpush.msrb.mxu3 %v939_v6  ;;  %v892_v6 = vld [vmem:[#allocation8 + $0x68] sm:$0xff] }
 0x1d3   : > { %844 = vmatpush.msrb.mxu0 %v756_v14  ;;  %864 = vmatpush.msrb.mxu1 %v788_v15  ;;  %v937_v14 = vld [vmem:[#allocation8 + $0x1d0] sm:$0xff]  ;;  %v520_v15 = vpop.permute.xlu1 %519 }
 0x1d4   : > { %813 = vmatpush.msra.mxu2 %v737_v51  ;;  %965 = vmatpush.msrb.mxu3 %v937_v14  ;;  %v921_v14 = vld [vmem:[#allocation8 + $0x150] sm:$0xff] }
 0x1d5   : > { %845 = vmatpush.msrb.mxu0 %v754_v18  ;;  %865 = vmatpush.msrb.mxu1 %v786_v19  ;;  %v906_v18 = vld [vmem:[#allocation8 + $0xd8] sm:$0xff] }
 0x1d6   : > { %814 = vmatpush.msra.mxu2 %v735_v57  ;;  %v938_v19 = vld [vmem:[#allocation8 + $0x1d8] sm:$0xff] }
 0x1d7   : > { %846 = vmatpush.msrb.mxu0 %v752_v22  ;;  %866 = vmatpush.msrb.mxu1 %v784_v23  ;;  %v935_v23 = vld [vmem:[#allocation8 + $0x1c0] sm:$0xff] }
 0x1d8   : > { %943 = vmatpush.msrb.mxu2 %v909_v61  ;;  %966 = vmatpush.msrb.mxu3 %v935_v23 }
 0x1d9   : > { %847 = vmatpush.msrb.mxu0 %v750_v26  ;;  %867 = vmatpush.msrb.mxu1 %v782_v27  ;;  %v901_v26 = vld [vmem:[#allocation8 + $0xb0] sm:$0xff] }
 0x1da   : > { %944 = vmatpush.msrb.mxu2 %v907_v5  ;;  %v933_v27 = vld [vmem:[#allocation8 + $0x1b0] sm:$0xff]  ;;  %v923_v5 = vld [vmem:[#allocation8 + $0x160] sm:$0xff] }
 0x1db   : > { %848 = vmatpush.msrb.mxu0 %v748_v30  ;;  %868 = vmatpush.msrb.mxu1 %v780_v31  ;;  %v934_v30 = vld [vmem:[#allocation8 + $0x1b8] sm:$0xff] }
 0x1dc   : > { %945 = vmatpush.msrb.mxu2 %v905_v13  ;;  %967 = vmatpush.msrb.mxu3 %v933_v27 }
 0x1dd   : > { %849 = vmatpush.msrb.mxu0 %v746_v34  ;;  %869 = vmatpush.msrb.mxu1 %v778_v35  ;;  %v900_v34 = vld [vmem:[#allocation8 + $0xa8] sm:$0xff] }
 0x1de   : > { %946 = vmatpush.msrb.mxu2 %v903_v20  ;;  %968 = vmatpush.msrb.mxu3 %v931_v33 }
 0x1df   : > { %850 = vmatpush.msrb.mxu0 %v744_v38  ;;  %870 = vmatpush.msrb.mxu1 %v776_v39  ;;  %v929_v39 = vld [vmem:[#allocation8 + $0x190] sm:$0xff] }
 0x1e0   : > { %947 = vmatpush.msrb.mxu2 %v901_v26  ;;  %969 = vmatpush.msrb.mxu3 %v929_v39 }
 0x1e1   : > { %851 = vmatpush.msrb.mxu0 %v742_v42  ;;  %871 = vmatpush.msrb.mxu1 %v774_v43  ;;  %v930_v42 = vld [vmem:[#allocation8 + $0x198] sm:$0xff]  ;;  %v895_v43 = vld [vmem:[#allocation8 + $0x80] sm:$0xff] }
 0x1e2   : > { %948 = vmatpush.msrb.mxu2 %v899_v32  ;;  %v920_v32 = vld [vmem:[#allocation8 + $0x148] sm:$0xff] }
 0x1e3   : > { %852 = vmatpush.msrb.mxu0 %v740_v46  ;;  %872 = vmatpush.msrb.mxu1 %v772_v48  ;;  %v927_v46 = vld [vmem:[#allocation8 + $0x180] sm:$0xff] }
 0x1e4   : > { %949 = vmatpush.msrb.mxu2 %v897_v37  ;;  %970 = vmatpush.msrb.mxu3 %v927_v46 }
 0x1e5   : > { %853 = vmatpush.msrb.mxu0 %v738_v53  ;;  %873 = vmatpush.msrb.mxu1 %v770_v56  ;;  %v893_v53 = vld [vmem:[#allocation8 + $0x70] sm:$0xff] }
 0x1e6   : > { %950 = vmatpush.msrb.mxu2 %v895_v43  ;;  %v886_v43 = vld [vmem:[#allocation8 + $0x38] sm:$0xff] }
 0x1e7   : > { %854 = vmatpush.msrb.mxu0 %v736_v59  ;;  %874 = vmatpush.msrb.mxu1 %v768_v60  ;;  %v925_v59 = vld [vmem:[#allocation8 + $0x170] sm:$0xff]  ;;  %v894_v60 = vld [vmem:[#allocation8 + $0x78] sm:$0xff] }
 0x1e8   : > { %951 = vmatpush.msrb.mxu2 %v893_v53  ;;  %971 = vmatpush.msrb.mxu3 %v925_v59 }
 0x1e9   : > { %983 = vmatpush.msra.mxu0 %v910_v1  ;;  %1003 = vmatpush.msra.mxu1 %v942_v2  ;;  %v891_v1 = vld [vmem:[#allocation8 + $0x60] sm:$0xff] }
 0x1ea   : > { %952 = vmatpush.msrb.mxu2 %v891_v1  ;;  %972 = vmatpush.msrb.mxu3 %v923_v5  ;;  %v881_v1 = vld [vmem:[#allocation8 + $0x10] sm:$0xff] }
 0x1eb   : > { %984 = vmatpush.msra.mxu0 %v908_v7  ;;  %1004 = vmatpush.msra.mxu1 %v940_v12 }
 0x1ec   : > { %973 = vmatpush.msrb.mxu3 %v921_v14 }
 0x1ed   : > { %985 = vmatpush.msra.mxu0 %v906_v18  ;;  %1005 = vmatpush.msra.mxu1 %v938_v19  ;;  %v887_v19 = vld [vmem:[#allocation8 + $0x40] sm:$0xff] }
 0x1ef   : > { %986 = vmatpush.msra.mxu0 %v904_v24  ;;  %1006 = vmatpush.msra.mxu1 %v936_v25  ;;  %v919_v24 = vld [vmem:[#allocation8 + $0x140] sm:$0xff]  ;;  %v888_v25 = vld [vmem:[#allocation8 + $0x48] sm:$0xff] }
 0x1f0   : > { %974 = vmatpush.msrb.mxu3 %v919_v24 }
 0x1f1   : > { %987 = vmatpush.msra.mxu0 %v902_v29  ;;  %1007 = vmatpush.msra.mxu1 %v934_v30 }
 0x1f3   : > { %988 = vmatpush.msra.mxu0 %v900_v34  ;;  %1008 = vmatpush.msra.mxu1 %v932_v36 }
 0x1f5   : > { %989 = vmatpush.msra.mxu0 %v898_v40  ;;  %1009 = vmatpush.msra.mxu1 %v930_v42  ;;  %v917_v42 = vld [vmem:[#allocation8 + $0x130] sm:$0xff] }
 0x1f6   : > { %975 = vmatpush.msrb.mxu3 %v917_v42 }
 0x1f7   : > { %1010 = vmatpush.msra.mxu1 %v928_v52 }
 0x1f9   : > { %1011 = vmatpush.msra.mxu1 %v926_v0  ;;  %v916_v0 = vld [vmem:[#allocation8 + $0x128] sm:$0xff] }
 0x245   : > { %v546_v49 = vpop.f32.mrf.mxu0  ;;  %v569_v50 = vpop.f32.mrf.mxu1 }
 0x246   : > { %v1874_v54 = vadd.f32 %v546_v49, %v515_v47  ;;  %v1876_v55 = vadd.f32 %v569_v50, %v515_v47  ;;  %v896_v47 = vld [vmem:[#allocation8 + $0x88] sm:$0xff] }
 0x247   : > { %990 = vmatpush.msra.mxu0 %v896_v47 }
 0x248   : > { %v1879_v62 = vmul.f32 0.70710677, %v1874_v54  ;;  %v1882_v63 = vmul.f32 0.70710677, %v1876_v55 }
 0x249   : > { %991 = vmatpush.msra.mxu0 %v894_v60 }
 0x24a   : > { %v1885_v3 = vand.u32 2147483647, %v1879_v62  ;;  %v1888_v4 = vand.u32 2147483647, %v1882_v63 }
 0x24b   : > { %992 = vmatpush.msra.mxu0 %v892_v6  ;;  %v913_v6 = vld [vmem:[#allocation8 + $0x110] sm:$0xff] }
 0x24c   : > { %v595_v8 = vmul.f32 0.3275911, %v1885_v3  ;;  %v596_v9 = vmul.f32 0.3275911, %v1888_v4  ;;  %v699_v50 = vsub.f32 0.0, %v1885_v3  ;;  %v700_v57 = vsub.f32 0.0, %v1888_v4 }
 0x24d   : > { %v549_v10 = vpop.f32.mrf.mxu0  ;;  %v572_v11 = vpop.f32.mrf.mxu1 }
 0x24e   : > { %v1892_v16 = vadd.f32 1.0, %v595_v8  ;;  %v1894_v17 = vadd.f32 1.0, %v596_v9  ;;  %v1896_v21 = vadd.f32 %v549_v10, %v520_v15  ;;  %v1898_v22 = vadd.f32 %v572_v11, %v520_v15  ;;  %v924_v9 = vld [vmem:[#allocation8 + $0x168] sm:$0xff]  ;;  %v889_v10 = vld [vmem:[#allocation8 + $0x50] sm:$0xff]  ;;  %v890_v15 = vld [vmem:[#allocation8 + $0x58] sm:$0xff] }
 0x24f   : > { %v703_v8 = vmul.f32 %v699_v50, %v1885_v3  ;;  %v704_v13 = vmul.f32 %v700_v57, %v1888_v4  ;;  %v922_v3 = vld [vmem:[#allocation8 + $0x158] sm:$0xff]  ;;  %1012 = vmatpush.msra.mxu1 %v924_v9  ;;  %953 = vmatpush.msrb.mxu2 %v889_v10  ;;  %v883_v50 = vld [vmem:[#allocation8 + $0x20] sm:$0xff]  ;;  %v884_v57 = vld [vmem:[#allocation8 + $0x28] sm:$0xff] }
 0x250   : > { %1402 = vrcp.f32 %v1892_v16  ;;  %v1903_v28 = vmul.f32 0.70710677, %v1896_v21  ;;  %v1906_v31 = vmul.f32 0.70710677, %v1898_v22  ;;  %v614_v7 = vand.u32 2147483648, %v1892_v16  ;;  %993 = vmatpush.msra.mxu0 %v890_v15 }
 0x251   : > { %1404 = vrcp.f32 %v1894_v17  ;;  %v612_v12 = vand.u32 2147483647, %v1892_v16  ;;  %vm608_vm7 = vweird.f32 %v1892_v16  ;;  %v627_v23 = vand.u32 2147483647, %v1894_v17  ;;  %1013 = vmatpush.msra.mxu1 %v922_v3  ;;  %954 = vmatpush.msrb.mxu2 %v887_v19  ;;  %v880_v3 = vld [vmem:[#allocation8 + $0x8] sm:$0xff] }
 0x252   : > { %v1909_v35 = vand.u32 2147483647, %v1903_v28  ;;  %v1912_v38 = vand.u32 2147483647, %v1906_v31  ;;  %v629_v4 = vand.u32 2147483648, %v1894_v17  ;;  %v615_v27 = vor.u32 1.1754944e-38, %v614_v7  ;;  %994 = vmatpush.msra.mxu0 %v888_v25 }
 0x253   : > { %vm623_vm9 = vweird.f32 %v1894_v17  ;;  %v1954_v30 = vmul.f32 1.442695, %v703_v8  ;;  %vm613_vm10 = vcmp.eq.f32.partialorder %v612_v12, 8.507059e+37  ;;  %vm628_vm12 = vcmp.eq.f32.partialorder %v627_v23, 8.507059e+37  ;;  %1014 = vmatpush.msra.mxu1 %v920_v32  ;;  %v882_v7 = vld [vmem:[#allocation8 + $0x18] sm:$0xff]  ;;  %v879_v12 = vld [vmem:[#allocation8] sm:$0xff] }
 0x254   : > { %v597_v41 = vmul.f32 0.3275911, %v1909_v35  ;;  %v598_v45 = vmul.f32 0.3275911, %v1912_v38  ;;  %v630_v36 = vor.u32 1.1754944e-38, %v629_v4  ;;  %995 = vmatpush.msra.mxu0 %v886_v43  ;;  %v701_v14 = vsub.f32 0.0, %v1909_v35 }
 0x255   : > { %v912_v23 = vld [vmem:[#allocation8 + $0x108] sm:$0xff]  ;;  %v702_v32 = vsub.f32 0.0, %v1912_v38 }
 0x256   : > { %v1915_v44 = vpop.eup %1402  ;;  %v1923_v51 = vadd.f32 1.0, %v597_v41  ;;  %v1928_v58 = vadd.f32 1.0, %v598_v45  ;;  %996 = vmatpush.msra.mxu0 %v884_v57  ;;  %v705_v42 = vmul.f32 %v701_v14, %v1909_v35 }
 0x257   : > { %v1918_v48 = vpop.eup %1404  ;;  %v604_v49 = vmul.f32 %v1915_v44, %v1892_v16  ;;  %vm609_vm5 = vweird.f32 %v1915_v44 }
 0x258   : > { %v619_v56 = vmul.f32 %v1918_v48, %v1894_v17  ;;  %1406 = vrcp.f32 %v1923_v51  ;;  %vm624_vm6 = vweird.f32 %v1918_v48  ;;  %vm1946_vm8 = vmor %vm608_vm7, %vm609_vm5  ;;  %v885_v17 = vld [vmem:[#allocation8 + $0x30] sm:$0xff]  ;;  %v644_v53 = vand.u32 2147483648, %v1923_v51  ;;  %997 = vmatpush.msra.mxu0 %v882_v7 }
 0x259   : > { %v605_v61 = vsub.f32 1.0, %v604_v49  ;;  %1408 = vrcp.f32 %v1928_v58  ;;  %vm1961_vm11 = vmor %vm623_vm9, %vm624_vm6  ;;  %v918_v49 = vld [vmem:[#allocation8 + $0x138] sm:$0xff]  ;;  %955 = vmatpush.msrb.mxu2 %v885_v17  ;;  %v659_v60 = vand.u32 2147483648, %v1928_v58  ;;  %v642_v8 = vand.u32 2147483647, %v1923_v51 }
 0x25a   : > { %v620_v2 = vsub.f32 1.0, %v619_v56  ;;  %v915_v56 = vld [vmem:[#allocation8 + $0x120] sm:$0xff]  ;;  %1015 = vmatpush.msra.mxu1 %v918_v49  ;;  %vm638_vm15 = vweird.f32 %v1923_v51  ;;  %vm653_vm0 = vweird.f32 %v1928_v58  ;;  %998 = vmatpush.msra.mxu0 %v880_v3  ;;  %1410 = vpow2.f32 %v1954_v30 }
 0x25b   : > { %v606_v11 = vmul.f32 %v1915_v44, %v605_v61  ;;  %956 = vmatpush.msrb.mxu2 %v883_v50  ;;  %976 = vmatpush.msrb.mxu3 %v915_v56  ;;  %vm643_vm2 = vcmp.eq.f32.partialorder %v642_v8, 8.507059e+37  ;;  %v711_v56 = vmul.f32 1.442695, %v705_v42  ;;  %vm583_vm6 = vcmp.ge.f32.partialorder %v1879_v62, 0.0 }
 0x25c   : > { %v621_v18 = vmul.f32 %v1918_v48, %v620_v2  ;;  %1016 = vmatpush.msra.mxu1 %v916_v0  ;;  %vm584_vm7 = vcmp.ge.f32.partialorder %v1882_v63, 0.0  ;;  %v575_v62 = vmul.f32 0.5, %v1874_v54  ;;  %v576_v63 = vmul.f32 0.5, %v1876_v55 }
 0x25d   : > { %v607_v20 = vadd.f32 %v1915_v44, %v606_v11  ;;  %v914_v11 = vld [vmem:[#allocation8 + $0x118] sm:$0xff]  ;;  %957 = vmatpush.msrb.mxu2 %v881_v1  ;;  %977 = vmatpush.msrb.mxu3 %v913_v6  ;;  %vm586_vm9 = vcmp.ge.f32.partialorder %v1906_v31, 0.0 }
 0x25e   : > { %v622_v29 = vadd.f32 %v1918_v48, %v621_v18  ;;  %v1952_v16 = vpop.eup %1406  ;;  %v911_v18 = vld [vmem:[#allocation8 + $0x100] sm:$0xff]  ;;  %1017 = vmatpush.msra.mxu1 %v914_v11 }
 0x25f   : > { %v611_v33 = vsel %vm1946_vm8, %v1915_v44, %v607_v20  ;;  %v1965_v37 = vpop.eup %1408  ;;  %v634_v39 = vmul.f32 %v1952_v16, %v1923_v51  ;;  %v1974_v44 = vmul.f32 1.442695, %v704_v13  ;;  %vm639_vm13 = vweird.f32 %v1952_v16  ;;  %958 = vmatpush.msrb.mxu2 %v879_v12  ;;  %978 = vmatpush.msrb.mxu3 %v911_v18 }
 0x260   : > { %v1969_v40 = vsel %vm613_vm10, %v615_v27, %v611_v33  ;;  %v626_v41 = vsel %vm1961_vm11, %v1918_v48, %v622_v29  ;;  %v649_v45 = vmul.f32 %v1965_v37, %v1928_v58  ;;  %vm654_vm14 = vweird.f32 %v1965_v37  ;;  %vm640_vm1 = vmor %vm638_vm15, %vm639_vm13  ;;  %1018 = vmatpush.msra.mxu1 %v912_v23 }
 0x261   : > { %v663_v46 = vmul.f32 1.0614054, %v1969_v40  ;;  %v1979_v47 = vsel %vm628_vm12, %v630_v36, %v626_v41  ;;  %v635_v52 = vsub.f32 1.0, %v634_v39  ;;  %v657_v13 = vand.u32 2147483647, %v1928_v58  ;;  %vm655_vm3 = vmor %vm653_vm0, %vm654_vm14 }
 0x262   : > { %v664_v48 = vmul.f32 1.0614054, %v1979_v47  ;;  %v650_v59 = vsub.f32 1.0, %v649_v45  ;;  %v645_v51 = vor.u32 1.1754944e-38, %v644_v53  ;;  %v660_v58 = vor.u32 1.1754944e-38, %v659_v60 }
 0x263   : > { %v667_v61 = vadd.f32 -1.4531521, %v663_v46  ;;  %v636_v2 = vmul.f32 %v1952_v16, %v635_v52  ;;  %vm658_vm5 = vcmp.eq.f32.partialorder %v657_v13, 8.507059e+37  ;;  %1412 = vpow2.f32 %v1974_v44 }
 0x264   : > { %v668_v5 = vadd.f32 -1.4531521, %v664_v48  ;;  %v651_v9 = vmul.f32 %v1965_v37, %v650_v59  ;;  %v706_v45 = vmul.f32 %v702_v32, %v1912_v38  ;;  %v1411_v59 = vpop.eup %1410  ;;  %1414 = vpow2.f32 %v711_v56  ;;  %v1112_v56 = vld [vmem:[%s2073_s9 + $0x8] sm:$0xff] }
 0x265   : > { %v671_v10 = vmul.f32 %v667_v61, %v1969_v40  ;;  %v637_v19 = vadd.f32 %v1952_v16, %v636_v2  ;;  %vm585_vm8 = vcmp.ge.f32.partialorder %v1903_v28, 0.0  ;;  %v577_v32 = vmul.f32 0.5, %v1896_v21 }
 0x266   : > { %v672_v15 = vmul.f32 %v668_v5, %v1979_v47  ;;  %v652_v4 = vadd.f32 %v1965_v37, %v651_v9  ;;  %v713_v44 = vmul.f32 1.442695, %v706_v45  ;;  %v578_v28 = vmul.f32 0.5, %v1898_v22 }
 0x267   : > { %v675_v20 = vadd.f32 1.4214138, %v671_v10  ;;  %v641_v25 = vsel %vm640_vm1, %v1952_v16, %v637_v19 }
 0x268   : > { %v676_v24 = vadd.f32 1.4214138, %v672_v15  ;;  %v646_v27 = vsel %vm643_vm2, %v645_v51, %v641_v25  ;;  %v656_v29 = vsel %vm655_vm3, %v1965_v37, %v652_v4  ;;  %1416 = vpow2.f32 %v713_v44 }
 0x269   : > { %v679_v26 = vmul.f32 %v675_v20, %v1969_v40  ;;  %v665_v34 = vmul.f32 1.0614054, %v646_v27  ;;  %v661_v16 = vsel %vm658_vm5, %v660_v58, %v656_v29  ;;  %v1413_v61 = vpop.eup %1412 }
 0x26a   : > { %v680_v33 = vmul.f32 %v676_v24, %v1979_v47  ;;  %v666_v17 = vmul.f32 1.0614054, %v661_v16  ;;  %v1415_v19 = vpop.eup %1414 }
 0x26b   : > { %v683_v36 = vadd.f32 -0.28449672, %v679_v26  ;;  %v669_v41 = vadd.f32 -1.4531521, %v665_v34 }
 0x26c   : > { %v684_v39 = vadd.f32 -0.28449672, %v680_v33  ;;  %v670_v43 = vadd.f32 -1.4531521, %v666_v17 }
 0x26d   : > { %v687_v37 = vmul.f32 %v683_v36, %v1969_v40  ;;  %v673_v49 = vmul.f32 %v669_v41, %v646_v27  ;;  %v1023_v41 = vld [vmem:[#allocation10] sm:$0xff] }
 0x26e   : > { %v688_v46 = vmul.f32 %v684_v39, %v1979_v47  ;;  %v674_v52 = vmul.f32 %v670_v43, %v661_v16  ;;  %v1417_v51 = vpop.eup %1416 }
 0x26f   : > { %v691_v50 = vadd.f32 0.2548296, %v687_v37  ;;  %v677_v48 = vadd.f32 1.4214138, %v673_v49 }
 0x270   : > { %v692_v53 = vadd.f32 0.2548296, %v688_v46  ;;  %v678_v57 = vadd.f32 1.4214138, %v674_v52  ;;  %v1024_v46 = vld [vmem:[#allocation11] sm:$0xff] }
 0x271   : > { %v695_v30 = vmul.f32 %v691_v50, %v1969_v40  ;;  %v681_v60 = vmul.f32 %v677_v48, %v646_v27  ;;  %v1688_v40 = vmov -1.0  }
 0x272   : > { %v696_v35 = vmul.f32 %v692_v53, %v1979_v47  ;;  %v682_v0 = vmul.f32 %v678_v57, %v661_v16  ;;  %v587_v7 = vsel %vm583_vm6, 1.0, %v1688_v40  ;;  %v588_v47 = vsel %vm584_vm7, 1.0, %v1688_v40 }
 0x273   : > { %v715_v38 = vmul.f32 %v1411_v59, %v695_v30  ;;  %v685_v2 = vadd.f32 -0.28449672, %v681_v60  ;;  %v589_v58 = vsel %vm585_vm8, 1.0, %v1688_v40  ;;  %v590_v26 = vsel %vm586_vm9, 1.0, %v1688_v40 }
 0x274   : > { %v716_v1 = vmul.f32 %v1413_v61, %v696_v35  ;;  %v686_v6 = vadd.f32 -0.28449672, %v682_v0  ;;  %v1111_v35 = vld [vmem:[%s2073_s9] sm:$0xff] }
 0x275   : > { %v719_v5 = vsub.f32 1.0, %v715_v38  ;;  %v689_v9 = vmul.f32 %v685_v2, %v646_v27 }
 0x276   : > { %v720_v8 = vsub.f32 1.0, %v716_v1  ;;  %v690_v11 = vmul.f32 %v686_v6, %v661_v16 }
 0x277   : > { %v723_v10 = vmul.f32 %v719_v5, %v587_v7  ;;  %v693_v13 = vadd.f32 0.2548296, %v689_v9 }
 0x278   : > { %v724_v12 = vmul.f32 %v720_v8, %v588_v47  ;;  %v694_v15 = vadd.f32 0.2548296, %v690_v11 }
 0x279   : > { %v727_v14 = vadd.f32 1.0, %v723_v10  ;;  %v697_v3 = vmul.f32 %v693_v13, %v646_v27 }
 0x27a   : > { %v728_v18 = vadd.f32 1.0, %v724_v12  ;;  %v698_v23 = vmul.f32 %v694_v15, %v661_v16 }
 0x27b   : > { %v731_v20 = vmul.f32 %v727_v14, %v575_v62  ;;  %v717_v24 = vmul.f32 %v1415_v19, %v697_v3 }
 0x27c   : > { %v732_v4 = vmul.f32 %v728_v18, %v576_v63  ;;  %v718_v25 = vmul.f32 %v1417_v51, %v698_v23 }
 0x27d   : > { %815 = vmatmul.f32.vlgmr.msra.gmra.mxu2 %v731_v20  ;;  %855 = vmatmul.f32.vlgmr.msrb.gmra.mxu0 %v731_v20  ;;  %v721_v54 = vsub.f32 1.0, %v717_v24 }
 0x27e   : > { %835 = vmatmul.f32.vlgmr.msra.gmra.mxu3 %v732_v4  ;;  %875 = vmatmul.f32.vlgmr.msrb.gmra.mxu1 %v732_v4  ;;  %v722_v55 = vsub.f32 1.0, %v718_v25 }
 0x27f   : > { %v725_v27 = vmul.f32 %v721_v54, %v589_v58 }
 0x280   : > { %v726_v29 = vmul.f32 %v722_v55, %v590_v26 }
 0x281   : > { %v729_v33 = vadd.f32 1.0, %v725_v27 }
 0x282   : > { %v730_v34 = vadd.f32 1.0, %v726_v29 }
 0x283   : > { %v733_v16 = vmul.f32 %v729_v33, %v577_v32 }
 0x284   : > { %v734_v36 = vmul.f32 %v730_v34, %v578_v28 }
 0x285   : > { %959 = vmatmul.f32.vlgmr.msrb.gmra.mxu2 %v733_v16  ;;  %999 = vmatmul.f32.vlgmr.msra.gmra.mxu0 %v733_v16 }
 0x286   : > { %979 = vmatmul.f32.vlgmr.msrb.gmra.mxu3 %v734_v36  ;;  %1019 = vmatmul.f32.vlgmr.msra.gmra.mxu1 %v734_v36 }
 0x2fa   : > { %v856_v31 = vpop.f32.mrf.mxu0 }
 0x2fb   : > { %v876_v17 = vpop.f32.mrf.mxu1 }
 0x2fc   : > { %v877_v39 = vadd.f32 %v876_v17, %v856_v31 }
 0x2fe   : > { %1106 = vmatpush.msrb.mxu1 %v877_v39 }
 0x2ff   : > { %1279 = vmatmul.msk.f32.vlgmr.msrb.gmra.mxu1 %vm522_vm4, %v1023_v41 }
 0x300   : > { %v816_v42 = vpop.f32.mrf.mxu2 }
 0x301   : > { %v836_v21 = vpop.f32.mrf.mxu3 }
 0x302   : > { %v837_v37 = vadd.f32 %v836_v21, %v816_v42  ;;  %v1000_v43 = vpop.f32.mrf.mxu0 }
 0x303   : > { %v1020_v22 = vpop.f32.mrf.mxu1 }
 0x304   : > { %1086 = vmatpush.msrb.mxu0 %v837_v37  ;;  %v1021_v45 = vadd.f32 %v1020_v22, %v1000_v43 }
 0x305   : > { %1278 = vmatmul.msk.f32.vlgmr.msrb.gmra.mxu0 %vm522_vm4, %v1023_v41 }
 0x306   : > { %1063 = vmatpush.msra.mxu3 %v1021_v45 }
 0x307   : > { %1277 = vmatmul.msk.f32.vlgmr.msra.gmra.mxu3 %vm522_vm4, %v1024_v46 }
 0x308   : > { %v960_v49 = vpop.f32.mrf.mxu2 }
 0x309   : > { %v980_v50 = vpop.f32.mrf.mxu3 }
 0x30a   : > { %v981_v52 = vadd.f32 %v980_v50, %v960_v49 }
 0x30c   : > { %1043 = vmatpush.msra.mxu2 %v981_v52 }
 0x30d   : > { %1276 = vmatmul.msk.f32.vlgmr.msra.gmra.mxu2 %vm522_vm4, %v1024_v46 }
 0x37c   : > { %v1108_v53 = vpop.f32.mrf.mxu1 }
 0x382   : > { %v1088_v59 = vpop.f32.mrf.mxu0 }
 0x38a   : > { %v1065_v48 = vpop.f32.mrf.mxu3 }
 0x38b   : > { %v1109_v30 = vadd.f32 %v1108_v53, %v1065_v48 }
 0x38d   : > { %v1114_v57 = vadd.f32 %v1112_v56, %v1109_v30 }
 0x38f   : > { %1116 = vst [vmem:[%s444_s30 + $0x8] sm:$0xff] %v1114_v57 }
 0x390   : > { %v1045_v44 = vpop.f32.mrf.mxu2 }
 0x391   : > { %v1089_v60 = vadd.f32 %v1088_v59, %v1045_v44 }
 0x393   : > { %v1113_v61 = vadd.f32 %v1111_v35, %v1089_v60 }
 0x395   : > { %1115 = vst [vmem:[%s444_s30] sm:$0xff] %v1113_v61 }
 0x396   : > { %1625 = shalt.err (!%p1622_p8)
}
 0x397   : > { %1315 = dma.vmem_to_hbm [thread:$0]  (%p1782_p5), %s1132_s29, 256, %s1134_s20, %s1118_s17  }
 0x398 PF: > { %p1352_p9 = scmp.ge.s32.totalorder %s1676_s16, 2  ;;  %s1145_s2 = sand.u32 1, %s1664_s13  }
 0x399   : > { %s1146_s15 = scalar_lea.sflag [#allocation4], %s1145_s2 }
 0x39a   : > { %p1337_p10 = pnand %p1352_p9, %p1786_p6 }
 0x39c   : > { %p1338_p11 = pneg %p1337_p10 }
 0x39e   : > { %1659 = dma.done.wait (%p1338_p11), %s1146_s15, 256  }
 0x39f   : > { %1661 = vsyncadd (%p1338_p11), %s1146_s15, 4294967040  ;;  %s2095_s16 = sld [smem:[#allocation20_spill]]  ;;  %s2098_s13 = smov %s1668_s14 }
 0x3a0   : > { %s2096_s22 = sld [smem:[#allocation19_spill]] }
 0x3a1   : > { %s2097_s15 = sld [smem:[#allocation21_spill]] }
 0x3a5   : > { %p24_p12 = scmp.ge.s32.totalorder %s2095_s16, 4  }
 0x3a6   : > { %s2099_s14 = smov %s2096_s22 }
 0x3a7   :  { %26 = sbr.rel (!%p24_p12) target bundleno = 11 (0xb), region = 120 }
 0x3ac   :  { %1152 = vsyncpa [#allocation3], 1 }
 0x3ad   :  { %1154 = vsyncpa [#allocation3 + $0x1], 1 }
 0x3ae   :  { %1155 = vsyncpa [#allocation6], 1 }
 0x3af   :  { %1156 = vsyncpa [#allocation9], 1 }
 0x3b0   :  { %1157 = vsyncpa [#allocation12], 1 }
 0x3b1   :  { %1158 = vsyncpa [#allocation4], 1 }
 0x3b2   :  { %1160 = vsyncpa [#allocation4 + $0x1], 1 }

</bundles_post_ra>
